<compile_context>
chip_gen: v6e
topology: v6e:2x2x1
jax: 0.10.0
libtpu: 0.0.40
codegen_flags: <defaults>
</compile_context>

<pallas_src>
import functools
import math

import numpy as np
import jax
import jax.numpy as jnp
from jax.experimental import pallas as pl
from jax.experimental.pallas import tpu as pltpu


# ----------------------------------- kernel -----------------------------------
def _fused_kernel(C, has_add, fused, *refs):
    """One grid step: TB folded sequences -> out1 (rows, 2C), out2 (rows, 4C).

    Row r of the folded block belongs to sequence r // L at position r % L.
    Lane layout: out1 row l = [out1[2l] | out1[2l+1]]
                 out2 row l = [out2[4l] | out2[4l+1] | out2[4l+2] | out2[4l+3]]
    """
    refs = list(refs)
    x_ref = refs.pop(0)
    x2_ref = refs.pop(0) if has_add else None
    kd_ref = refs.pop(0) if fused else None   # 0 at sequence starts, else 1
    ku_ref = refs.pop(0) if fused else None   # 0 at sequence ends,   else 1
    (w1e_ref, w1o_ref, w2a_ref, w2b_ref, w2ba_ref,
     b1_ref, b2_ref, o1_ref, o2_ref) = refs

    x = x_ref[0]                                   # (rows, C), model dtype
    out_dtype = o1_ref.dtype

    def shift_down(v):                             # y[r] = v[r-1]; 0 at sequence starts
        y = jnp.concatenate([jnp.zeros((1, C), v.dtype), v[:-1]], axis=0)
        if fused:
            y = y * kd_ref[...].astype(v.dtype)
        return y

    def shift_up(v):                               # y[r] = v[r+1]; 0 at sequence ends
        y = jnp.concatenate([v[1:], jnp.zeros((1, C), v.dtype)], axis=0)
        if fused:
            y = y * ku_ref[...].astype(v.dtype)
        return y

    # ---- stage 1: nearest-2x upsample + conv1 (+ residual), K-packed -------
    lhs_e = jnp.concatenate([shift_down(x), x], axis=-1)           # (rows, 2C)
    lhs_o = jnp.concatenate([x, shift_up(x)], axis=-1)             # (rows, 2C)
    e1 = jnp.dot(lhs_e, w1e_ref[...], preferred_element_type=jnp.float32)
    o1 = jnp.dot(lhs_o, w1o_ref[...], preferred_element_type=jnp.float32)
    out1 = jnp.concatenate([e1, o1], axis=-1) + b1_ref[...]        # (rows, 2C) f32
    if has_add:
        out1 = out1 + x2_ref[0].astype(jnp.float32)
    out1_m = out1.astype(out_dtype)    # model dtype: stored AND fed to stage 2
    o1_ref[0] = out1_m

    # ---- stage 2: nearest-2x upsample + conv2 on the in-register out1 ------
    e1m = out1_m[:, :C]                            # out1[2l]
    o1m = out1_m[:, C:]                            # out1[2l+1]
    lhs_q = jnp.concatenate([shift_down(o1m), e1m], axis=-1)       # residue 0
    lhs_r = jnp.concatenate([o1m, shift_up(e1m)], axis=-1)         # residue 3
    res0 = jnp.dot(lhs_q, w2a_ref[...], preferred_element_type=jnp.float32)
    res12 = jnp.dot(out1_m, w2ba_ref[...], preferred_element_type=jnp.float32)  # [r1|r2]
    res3 = jnp.dot(lhs_r, w2b_ref[...], preferred_element_type=jnp.float32)
    out2 = jnp.concatenate([res0, res12, res3], axis=-1) + b2_ref[...]  # (rows, 4C) f32
    o2_ref[0] = out2.astype(o2_ref.dtype)


# ------------------------------ host-side helpers ------------------------------
def _prep_weights(w1, b1, w2, b2, dtype):
    """PyTorch Conv1d weights (C_out, C_in, 3) -> K/N-packed matmul operands."""
    def taps(w):
        return (jnp.transpose(w[:, :, 0]),
                jnp.transpose(w[:, :, 1]),
                jnp.transpose(w[:, :, 2]))                      # (C_in, C_out) each
    a0, a1, a2 = taps(w1)
    w1e = jnp.concatenate([a0, a1 + a2], axis=0).astype(dtype)  # (2C, C) even rows
    w1o = jnp.concatenate([a0 + a1, a2], axis=0).astype(dtype)  # (2C, C) odd rows
    c0, c1, c2 = taps(w2)
    w2a = jnp.concatenate([c0, c1 + c2], axis=0).astype(dtype)  # (2C, C)
    w2b = jnp.concatenate([c0 + c1, c2], axis=0).astype(dtype)  # (2C, C)
    w2ba = jnp.concatenate([w2b, w2a], axis=1)                  # (2C, 2C) -> [res1 | res2]
    b1p = jnp.tile(b1, 2).reshape(1, -1).astype(jnp.float32)    # (1, 2C)
    b2p = jnp.tile(b2, 4).reshape(1, -1).astype(jnp.float32)    # (1, 4C)
    return w1e, w1o, w2a, w2b, w2ba, b1p, b2p


def _pick_batch_block(N, L, C, itemsize):
    """Fold TB batch elements per grid step (fills MXU M-dim, amortizes step cost)."""
    per_seq = L * C * (9 * 2 * itemsize + 24 * 4)   # pipelined blocks + f32 temps
    budget = 16 * 1024 * 1024
    tb = 1
    for d in range(1, N + 1):
        if N % d:
            continue
        if d * per_seq > budget:
            break
        tb = d
        if d * L >= 512:                            # enough rows; stop growing
            break
    return tb


def _vmem_limit_bytes(rows, C, itemsize):
    blocks = rows * C * itemsize * 9 * 2            # x,x2,out1,out2 blocks, double-buffered
    temps = rows * C * 4 * 24                       # f32 intermediates (upper bound)
    weights = 12 * C * C * 4 + 6 * C * 4            # single-buffered packed taps + biases
    masks = 2 * rows * 128 * itemsize               # (rows,1) masks, lane-padded
    est = blocks + temps + weights + masks + (2 << 20)
    try:
        info = pltpu.get_tpu_info()
        cap = int(getattr(info, "vmem_capacity_bytes", 64 << 20))
    except Exception:
        cap = 64 << 20
    return int(min(max(est, 16 << 20), cap * 3 // 4))


def upsampling_forward(x, x2, w1, b1, w2, b2, *, batch_block=None):
    """Pallas implementation of UpSampling.forward.

    x  : (N, L, C) channels-last, x2 : (N, 2L, C) or None
    w1, w2 : (C, C, 3) PyTorch Conv1d weights;  b1, b2 : (C,)
    returns (out1 (N, 2L, C), out2 (N, 4L, C))
    """
    N, L, C = x.shape
    dtype = x.dtype
    itemsize = jnp.dtype(dtype).itemsize
    has_add = x2 is not None

    tb = batch_block if batch_block is not None else _pick_batch_block(N, L, C, itemsize)
    assert N % tb == 0, "batch_block must divide N"
    nb = N // tb
    rows = tb * L
    fused = tb > 1

    packed = _prep_weights(w1, b1, w2, b2, dtype)

    def const_spec(shape):
        return pl.BlockSpec(shape, lambda i: (0, 0), pipeline_mode=pl.Buffered(1))

    # All reshapes below are row-major-preserving => metadata-only (free).
    inputs = [x.reshape(nb, rows, C)]
    in_specs = [pl.BlockSpec((1, rows, C), lambda i: (i, 0, 0))]
    if has_add:
        # (N, 2L, C) -> (nb, rows, 2C): row l holds [x2[2l] | x2[2l+1]] in lanes.
        inputs.append(x2.reshape(nb, rows, 2 * C))
        in_specs.append(pl.BlockSpec((1, rows, 2 * C), lambda i: (i, 0, 0)))
    if fused:
        l_pos = np.arange(rows) % L
        keep_down = jnp.asarray(l_pos != 0, dtype=dtype).reshape(rows, 1)
        keep_up = jnp.asarray(l_pos != L - 1, dtype=dtype).reshape(rows, 1)
        inputs += [keep_down, keep_up]
        in_specs += [const_spec((rows, 1)), const_spec((rows, 1))]
    inputs += list(packed)
    in_specs += [const_spec(p.shape) for p in packed]

    out_specs = [
        pl.BlockSpec((1, rows, 2 * C), lambda i: (i, 0, 0)),
        pl.BlockSpec((1, rows, 4 * C), lambda i: (i, 0, 0)),
    ]
    out_shapes = (
        jax.ShapeDtypeStruct((nb, rows, 2 * C), dtype),
        jax.ShapeDtypeStruct((nb, rows, 4 * C), dtype),
    )

    grid_spec = pltpu.PrefetchScalarGridSpec(
        num_scalar_prefetch=0,
        grid=(nb,),
        in_specs=in_specs,
        out_specs=out_specs,
    )

    o1p, o2p = pl.pallas_call(
        functools.partial(_fused_kernel, C, has_add, fused),
        out_shape=out_shapes,
        grid_spec=grid_spec,
        compiler_params=pltpu.CompilerParams(
            dimension_semantics=("parallel",),
            vmem_limit_bytes=_vmem_limit_bytes(rows, C, itemsize),
        ),
    )(*inputs)

    # Free reshapes back to the PyTorch layouts.
    return o1p.reshape(N, 2 * L, C), o2p.reshape(N, 4 * L, C)


# ----------------------------- plain-JAX reference -----------------------------
def _ref_conv1d(x_ncl, w, b):
    y = jax.lax.conv_general_dilated(
        x_ncl, w, window_strides=(1,), padding=((1, 1),),
        dimension_numbers=("NCH", "OIH", "NCH"))
    return y + b[None, :, None]


def ref_forward(x, x2, w1, b1, w2, b2):
    xt = jnp.transpose(x, (0, 2, 1))                        # (N, C, L)
    up1 = jnp.repeat(xt, 2, axis=-1)                        # (N, C, 2L)
    out1 = jnp.transpose(_ref_conv1d(up1, w1, b1), (0, 2, 1))
    if x2 is not None:
        out1 = out1 + x2
    up2 = jnp.repeat(jnp.transpose(out1, (0, 2, 1)), 2, axis=-1)
    out2 = jnp.transpose(_ref_conv1d(up2, w2, b2), (0, 2, 1))
    return out1, out2


if __name__ == "__main__":
    key = jax.random.PRNGKey(0)
    N, L, in_c = 2, 16, 8

    k1, k2, k3, k4, k5, k6 = jax.random.split(key, 6)
    bound = 1.0 / math.sqrt(in_c * 3)   # PyTorch Conv1d default init range
    w1 = jax.random.uniform(k1, (in_c, in_c, 3), jnp.float32, -bound, bound)
    b1 = jax.random.uniform(k2, (in_c,), jnp.float32, -bound, bound)
    w2 = jax.random.uniform(k3, (in_c, in_c, 3), jnp.float32, -bound, bound)
    b2 = jax.random.uniform(k4, (in_c,), jnp.float32, -bound, bound)

    x = jax.random.normal(k5, (N, L, in_c), jnp.float32)
    x2 = jax.random.normal(k6, (N, 2 * L, in_c), jnp.float32)

    # with residual; default picker folds both batch elements into one grid step
    out1, out2 = upsampling_forward(x, x2, w1, b1, w2, b2)
    jax.block_until_ready((out1, out2))
    assert out1.shape == (N, 2 * L, in_c)
    assert out2.shape == (N, 4 * L, in_c)
    r1, r2 = ref_forward(x, x2, w1, b1, w2, b2)
    np.testing.assert_allclose(np.asarray(out1), np.asarray(r1), rtol=1e-5, atol=1e-5)
    np.testing.assert_allclose(np.asarray(out2), np.asarray(r2), rtol=1e-5, atol=1e-5)

    # without residual (no zeros tensor synthesized); one sequence per grid step
    o1n, o2n = upsampling_forward(x, None, w1, b1, w2, b2, batch_block=1)
    jax.block_until_ready((o1n, o2n))
    rn1, rn2 = ref_forward(x, None, w1, b1, w2, b2)
    np.testing.assert_allclose(np.asarray(o1n), np.asarray(rn1), rtol=1e-5, atol=1e-5)
    np.testing.assert_allclose(np.asarray(o2n), np.asarray(rn2), rtol=1e-5, atol=1e-5)

    print("KERNEL_OK")
</pallas_src>

<mosaic_0001>
module attributes {stable_mosaic.version = 11 : i64} {
  func.func @_fused_kernel(%arg0: i32, %arg1: memref<1x32x8xf32, #tpu.memory_space<vmem>>, %arg2: memref<1x32x16xf32, #tpu.memory_space<vmem>>, %arg3: memref<32x1xf32, #tpu.memory_space<vmem>>, %arg4: memref<32x1xf32, #tpu.memory_space<vmem>>, %arg5: memref<16x8xf32, #tpu.memory_space<vmem>>, %arg6: memref<16x8xf32, #tpu.memory_space<vmem>>, %arg7: memref<16x8xf32, #tpu.memory_space<vmem>>, %arg8: memref<16x8xf32, #tpu.memory_space<vmem>>, %arg9: memref<16x16xf32, #tpu.memory_space<vmem>>, %arg10: memref<1x16xf32, #tpu.memory_space<vmem>>, %arg11: memref<1x32xf32, #tpu.memory_space<vmem>>, %arg12: memref<1x32x16xf32, #tpu.memory_space<vmem>>, %arg13: memref<1x32x32xf32, #tpu.memory_space<vmem>>) attributes {dimension_semantics = [#tpu.dimension_semantics<parallel>], iteration_bounds = array<i64: 1>, scalar_prefetch = 0 : i64, scratch_operands = 0 : i64, tpu.core_type = #tpu.core_type<tc>, window_params = [{transform_indices = @transform_0, window_bounds = array<i64: 1, 32, 8>}, {transform_indices = @transform_1, window_bounds = array<i64: 1, 32, 16>}, {pipeline_mode = #tpu.pipeline_mode<synchronous>, transform_indices = @transform_2, window_bounds = array<i64: 32, 1>}, {pipeline_mode = #tpu.pipeline_mode<synchronous>, transform_indices = @transform_3, window_bounds = array<i64: 32, 1>}, {pipeline_mode = #tpu.pipeline_mode<synchronous>, transform_indices = @transform_4, window_bounds = array<i64: 16, 8>}, {pipeline_mode = #tpu.pipeline_mode<synchronous>, transform_indices = @transform_5, window_bounds = array<i64: 16, 8>}, {pipeline_mode = #tpu.pipeline_mode<synchronous>, transform_indices = @transform_6, window_bounds = array<i64: 16, 8>}, {pipeline_mode = #tpu.pipeline_mode<synchronous>, transform_indices = @transform_7, window_bounds = array<i64: 16, 8>}, {pipeline_mode = #tpu.pipeline_mode<synchronous>, transform_indices = @transform_8, window_bounds = array<i64: 16, 16>}, {pipeline_mode = #tpu.pipeline_mode<synchronous>, transform_indices = @transform_9, window_bounds = array<i64: 1, 16>}, {pipeline_mode = #tpu.pipeline_mode<synchronous>, transform_indices = @transform_10, window_bounds = array<i64: 1, 32>}, {transform_indices = @transform_11, window_bounds = array<i64: 1, 32, 16>}, {transform_indices = @transform_12, window_bounds = array<i64: 1, 32, 32>}]} {
    %c0 = arith.constant 0 : index
    %c0_0 = arith.constant 0 : index
    %c0_1 = arith.constant 0 : index
    %0 = vector.load %arg1[%c0, %c0_0, %c0_1] : memref<1x32x8xf32, #tpu.memory_space<vmem>>, vector<1x32x8xf32>
    %1 = vector.shape_cast %0 : vector<1x32x8xf32> to vector<32x8xf32>
    %cst = arith.constant 0.000000e+00 : f32
    %2 = vector.broadcast %cst : f32 to vector<1x8xf32>
    %3 = vector.extract_strided_slice %1 {offsets = [0, 0], sizes = [31, 8], strides = [1, 1]} : vector<32x8xf32> to vector<31x8xf32>
    %4 = tpu.concatenate %2, %3 in 0 : vector<1x8xf32>, vector<31x8xf32> -> vector<32x8xf32>
    %c0_2 = arith.constant 0 : index
    %c0_3 = arith.constant 0 : index
    %5 = vector.load %arg3[%c0_2, %c0_3] : memref<32x1xf32, #tpu.memory_space<vmem>>, vector<32x1xf32>
    %6 = vector.broadcast %5 : vector<32x1xf32> to vector<32x8xf32>
    %7 = arith.mulf %4, %6 : vector<32x8xf32>
    %8 = tpu.concatenate %7, %1 in 1 : vector<32x8xf32>, vector<32x8xf32> -> vector<32x16xf32>
    %9 = vector.extract_strided_slice %1 {offsets = [1, 0], sizes = [31, 8], strides = [1, 1]} : vector<32x8xf32> to vector<31x8xf32>
    %cst_4 = arith.constant 0.000000e+00 : f32
    %10 = vector.broadcast %cst_4 : f32 to vector<1x8xf32>
    %11 = tpu.concatenate %9, %10 in 0 : vector<31x8xf32>, vector<1x8xf32> -> vector<32x8xf32>
    %c0_5 = arith.constant 0 : index
    %c0_6 = arith.constant 0 : index
    %12 = vector.load %arg4[%c0_5, %c0_6] : memref<32x1xf32, #tpu.memory_space<vmem>>, vector<32x1xf32>
    %13 = vector.broadcast %12 : vector<32x1xf32> to vector<32x8xf32>
    %14 = arith.mulf %11, %13 : vector<32x8xf32>
    %15 = tpu.concatenate %1, %14 in 1 : vector<32x8xf32>, vector<32x8xf32> -> vector<32x16xf32>
    %c0_7 = arith.constant 0 : index
    %c0_8 = arith.constant 0 : index
    %16 = vector.load %arg5[%c0_7, %c0_8] : memref<16x8xf32, #tpu.memory_space<vmem>>, vector<16x8xf32>
    %cst_9 = arith.constant dense<0.000000e+00> : vector<32x8xf32>
    %17 = tpu.matmul %8, %16, %cst_9 {dimension_numbers = #tpu.dot_dimension_numbers<[1], [0], [0], [1], [0, 0, 1, 1], [], []>} : vector<32x16xf32>, vector<16x8xf32>, vector<32x8xf32> -> vector<32x8xf32>
    %c0_10 = arith.constant 0 : index
    %c0_11 = arith.constant 0 : index
    %18 = vector.load %arg6[%c0_10, %c0_11] : memref<16x8xf32, #tpu.memory_space<vmem>>, vector<16x8xf32>
    %cst_12 = arith.constant dense<0.000000e+00> : vector<32x8xf32>
    %19 = tpu.matmul %15, %18, %cst_12 {dimension_numbers = #tpu.dot_dimension_numbers<[1], [0], [0], [1], [0, 0, 1, 1], [], []>} : vector<32x16xf32>, vector<16x8xf32>, vector<32x8xf32> -> vector<32x8xf32>
    %20 = tpu.concatenate %17, %19 in 1 : vector<32x8xf32>, vector<32x8xf32> -> vector<32x16xf32>
    %c0_13 = arith.constant 0 : index
    %c0_14 = arith.constant 0 : index
    %21 = vector.load %arg10[%c0_13, %c0_14] : memref<1x16xf32, #tpu.memory_space<vmem>>, vector<1x16xf32>
    %22 = vector.broadcast %21 : vector<1x16xf32> to vector<32x16xf32>
    %23 = arith.addf %20, %22 : vector<32x16xf32>
    %c0_15 = arith.constant 0 : index
    %c0_16 = arith.constant 0 : index
    %c0_17 = arith.constant 0 : index
    %24 = vector.load %arg2[%c0_15, %c0_16, %c0_17] : memref<1x32x16xf32, #tpu.memory_space<vmem>>, vector<1x32x16xf32>
    %25 = vector.shape_cast %24 : vector<1x32x16xf32> to vector<32x16xf32>
    %26 = arith.addf %23, %25 : vector<32x16xf32>
    %c0_18 = arith.constant 0 : index
    %c0_19 = arith.constant 0 : index
    %c0_20 = arith.constant 0 : index
    %27 = vector.load %arg12[%c0_18, %c0_19, %c0_20] : memref<1x32x16xf32, #tpu.memory_space<vmem>>, vector<1x32x16xf32>
    %28 = vector.shape_cast %27 : vector<1x32x16xf32> to vector<32x16xf32>
    %29 = vector.shape_cast %26 : vector<32x16xf32> to vector<1x32x16xf32>
    tpu.vector_store %arg12[%c0_18, %c0_19, %c0_20], %29 {strides = array<i32>} : memref<1x32x16xf32, #tpu.memory_space<vmem>>, vector<1x32x16xf32>,
    %30 = vector.extract_strided_slice %26 {offsets = [0, 0], sizes = [32, 8], strides = [1, 1]} : vector<32x16xf32> to vector<32x8xf32>
    %31 = vector.extract_strided_slice %26 {offsets = [0, 8], sizes = [32, 8], strides = [1, 1]} : vector<32x16xf32> to vector<32x8xf32>
    %cst_21 = arith.constant 0.000000e+00 : f32
    %32 = vector.broadcast %cst_21 : f32 to vector<1x8xf32>
    %33 = vector.extract_strided_slice %31 {offsets = [0, 0], sizes = [31, 8], strides = [1, 1]} : vector<32x8xf32> to vector<31x8xf32>
    %34 = tpu.concatenate %32, %33 in 0 : vector<1x8xf32>, vector<31x8xf32> -> vector<32x8xf32>
    %c0_22 = arith.constant 0 : index
    %c0_23 = arith.constant 0 : index
    %35 = vector.load %arg3[%c0_22, %c0_23] : memref<32x1xf32, #tpu.memory_space<vmem>>, vector<32x1xf32>
    %36 = vector.broadcast %35 : vector<32x1xf32> to vector<32x8xf32>
    %37 = arith.mulf %34, %36 : vector<32x8xf32>
    %38 = tpu.concatenate %37, %30 in 1 : vector<32x8xf32>, vector<32x8xf32> -> vector<32x16xf32>
    %39 = vector.extract_strided_slice %30 {offsets = [1, 0], sizes = [31, 8], strides = [1, 1]} : vector<32x8xf32> to vector<31x8xf32>
    %cst_24 = arith.constant 0.000000e+00 : f32
    %40 = vector.broadcast %cst_24 : f32 to vector<1x8xf32>
    %41 = tpu.concatenate %39, %40 in 0 : vector<31x8xf32>, vector<1x8xf32> -> vector<32x8xf32>
    %c0_25 = arith.constant 0 : index
    %c0_26 = arith.constant 0 : index
    %42 = vector.load %arg4[%c0_25, %c0_26] : memref<32x1xf32, #tpu.memory_space<vmem>>, vector<32x1xf32>
    %43 = vector.broadcast %42 : vector<32x1xf32> to vector<32x8xf32>
    %44 = arith.mulf %41, %43 : vector<32x8xf32>
    %45 = tpu.concatenate %31, %44 in 1 : vector<32x8xf32>, vector<32x8xf32> -> vector<32x16xf32>
    %c0_27 = arith.constant 0 : index
    %c0_28 = arith.constant 0 : index
    %46 = vector.load %arg7[%c0_27, %c0_28] : memref<16x8xf32, #tpu.memory_space<vmem>>, vector<16x8xf32>
    %cst_29 = arith.constant dense<0.000000e+00> : vector<32x8xf32>
    %47 = tpu.matmul %38, %46, %cst_29 {dimension_numbers = #tpu.dot_dimension_numbers<[1], [0], [0], [1], [0, 0, 1, 1], [], []>} : vector<32x16xf32>, vector<16x8xf32>, vector<32x8xf32> -> vector<32x8xf32>
    %c0_30 = arith.constant 0 : index
    %c0_31 = arith.constant 0 : index
    %48 = vector.load %arg9[%c0_30, %c0_31] : memref<16x16xf32, #tpu.memory_space<vmem>>, vector<16x16xf32>
    %cst_32 = arith.constant dense<0.000000e+00> : vector<32x16xf32>
    %49 = tpu.matmul %26, %48, %cst_32 {dimension_numbers = #tpu.dot_dimension_numbers<[1], [0], [0], [1], [0, 0, 1, 1], [], []>} : vector<32x16xf32>, vector<16x16xf32>, vector<32x16xf32> -> vector<32x16xf32>
    %c0_33 = arith.constant 0 : index
    %c0_34 = arith.constant 0 : index
    %50 = vector.load %arg8[%c0_33, %c0_34] : memref<16x8xf32, #tpu.memory_space<vmem>>, vector<16x8xf32>
    %cst_35 = arith.constant dense<0.000000e+00> : vector<32x8xf32>
    %51 = tpu.matmul %45, %50, %cst_35 {dimension_numbers = #tpu.dot_dimension_numbers<[1], [0], [0], [1], [0, 0, 1, 1], [], []>} : vector<32x16xf32>, vector<16x8xf32>, vector<32x8xf32> -> vector<32x8xf32>
    %52 = tpu.concatenate %47, %49, %51 in 1 : vector<32x8xf32>, vector<32x16xf32>, vector<32x8xf32> -> vector<32x32xf32>
    %c0_36 = arith.constant 0 : index
    %c0_37 = arith.constant 0 : index
    %53 = vector.load %arg11[%c0_36, %c0_37] : memref<1x32xf32, #tpu.memory_space<vmem>>, vector<1x32xf32>
    %54 = vector.broadcast %53 : vector<1x32xf32> to vector<32x32xf32>
    %55 = arith.addf %52, %54 : vector<32x32xf32>
    %c0_38 = arith.constant 0 : index
    %c0_39 = arith.constant 0 : index
    %c0_40 = arith.constant 0 : index
    %56 = vector.load %arg13[%c0_38, %c0_39, %c0_40] : memref<1x32x32xf32, #tpu.memory_space<vmem>>, vector<1x32x32xf32>
    %57 = vector.shape_cast %56 : vector<1x32x32xf32> to vector<32x32xf32>
    %58 = vector.shape_cast %55 : vector<32x32xf32> to vector<1x32x32xf32>
    tpu.vector_store %arg13[%c0_38, %c0_39, %c0_40], %58 {strides = array<i32>} : memref<1x32x32xf32, #tpu.memory_space<vmem>>, vector<1x32x32xf32>,
    return
  }
  func.func @transform_0(%arg0: i32) -> (i32, i32, i32) {
    %c0_i32 = arith.constant 0 : i32
    %c0_i32_0 = arith.constant 0 : i32
    %c0_i32_1 = arith.constant 0 : i32
    return %arg0, %c0_i32, %c0_i32_0 : i32, i32, i32
  }
  func.func @transform_1(%arg0: i32) -> (i32, i32, i32) {
    %c0_i32 = arith.constant 0 : i32
    %c0_i32_0 = arith.constant 0 : i32
    %c0_i32_1 = arith.constant 0 : i32
    return %arg0, %c0_i32, %c0_i32_0 : i32, i32, i32
  }
  func.func @transform_2(%arg0: i32) -> (i32, i32) {
    %c0_i32 = arith.constant 0 : i32
    %c0_i32_0 = arith.constant 0 : i32
    %c0_i32_1 = arith.constant 0 : i32
    return %c0_i32, %c0_i32_0 : i32, i32
  }
  func.func @transform_3(%arg0: i32) -> (i32, i32) {
    %c0_i32 = arith.constant 0 : i32
    %c0_i32_0 = arith.constant 0 : i32
    %c0_i32_1 = arith.constant 0 : i32
    return %c0_i32, %c0_i32_0 : i32, i32
  }
  func.func @transform_4(%arg0: i32) -> (i32, i32) {
    %c0_i32 = arith.constant 0 : i32
    %c0_i32_0 = arith.constant 0 : i32
    %c0_i32_1 = arith.constant 0 : i32
    return %c0_i32, %c0_i32_0 : i32, i32
  }
  func.func @transform_5(%arg0: i32) -> (i32, i32) {
    %c0_i32 = arith.constant 0 : i32
    %c0_i32_0 = arith.constant 0 : i32
    %c0_i32_1 = arith.constant 0 : i32
    return %c0_i32, %c0_i32_0 : i32, i32
  }
  func.func @transform_6(%arg0: i32) -> (i32, i32) {
    %c0_i32 = arith.constant 0 : i32
    %c0_i32_0 = arith.constant 0 : i32
    %c0_i32_1 = arith.constant 0 : i32
    return %c0_i32, %c0_i32_0 : i32, i32
  }
  func.func @transform_7(%arg0: i32) -> (i32, i32) {
    %c0_i32 = arith.constant 0 : i32
    %c0_i32_0 = arith.constant 0 : i32
    %c0_i32_1 = arith.constant 0 : i32
    return %c0_i32, %c0_i32_0 : i32, i32
  }
  func.func @transform_8(%arg0: i32) -> (i32, i32) {
    %c0_i32 = arith.constant 0 : i32
    %c0_i32_0 = arith.constant 0 : i32
    %c0_i32_1 = arith.constant 0 : i32
    return %c0_i32, %c0_i32_0 : i32, i32
  }
  func.func @transform_9(%arg0: i32) -> (i32, i32) {
    %c0_i32 = arith.constant 0 : i32
    %c0_i32_0 = arith.constant 0 : i32
    %c0_i32_1 = arith.constant 0 : i32
    return %c0_i32, %c0_i32_0 : i32, i32
  }
  func.func @transform_10(%arg0: i32) -> (i32, i32) {
    %c0_i32 = arith.constant 0 : i32
    %c0_i32_0 = arith.constant 0 : i32
    %c0_i32_1 = arith.constant 0 : i32
    return %c0_i32, %c0_i32_0 : i32, i32
  }
  func.func @transform_11(%arg0: i32) -> (i32, i32, i32) {
    %c0_i32 = arith.constant 0 : i32
    %c0_i32_0 = arith.constant 0 : i32
    %c0_i32_1 = arith.constant 0 : i32
    return %arg0, %c0_i32, %c0_i32_0 : i32, i32, i32
  }
  func.func @transform_12(%arg0: i32) -> (i32, i32, i32) {
    %c0_i32 = arith.constant 0 : i32
    %c0_i32_0 = arith.constant 0 : i32
    %c0_i32_1 = arith.constant 0 : i32
    return %arg0, %c0_i32, %c0_i32_0 : i32, i32, i32
  }
}

</mosaic_0001>

<bundles_post_ra>
// kernel: tpu_custom_call.1
= control target key start
LH: loop header
LB: loop body
LE: loop exit
PB: predicated region body
PF: predicated region fallthrough
CT: control target
= control target key end

     0   :  { %v1056_v2 = vmov 0   ;;  %s1383_s0 = inlined_call_operand.vmem [shape: f32[1,32,8], index: 0, kind: input, shape index: {}]   ;;  %s1384_s1 = inlined_call_operand.vmem [shape: f32[1,32,16], index: 1, kind: input, shape index: {}]   ;;  %s1385_s2 = inlined_call_operand.vmem [shape: f32[32,1], index: 2, kind: input, shape index: {}]   ;;  %s1386_s3 = inlined_call_operand.vmem [shape: f32[32,1], index: 3, kind: input, shape index: {}]   ;;  %s1387_s4 = inlined_call_operand.vmem [shape: f32[16,8], index: 4, kind: input, shape index: {}]   ;;  %s1388_s5 = inlined_call_operand.vmem [shape: f32[16,8], index: 5, kind: input, shape index: {}]   ;;  %s1389_s6 = inlined_call_operand.vmem [shape: f32[16,8], index: 6, kind: input, shape index: {}]   ;;  %s1390_s7 = inlined_call_operand.vmem [shape: f32[16,8], index: 7, kind: input, shape index: {}]   ;;  %s1391_s8 = inlined_call_operand.vmem [shape: f32[16,16], index: 8, kind: input, shape index: {}]   ;;  %s1392_s9 = inlined_call_operand.vmem [shape: f32[1,16], index: 9, kind: input, shape index: {}]   ;;  %s1393_s10 = inlined_call_operand.vmem [shape: f32[1,32], index: 10, kind: input, shape index: {}]   ;;  %s1394_s11 = inlined_call_operand.vmem [shape: f32[1,32,16], index: 11, kind: output, shape index: {0}]   ;;  %s1395_s12 = inlined_call_operand.hbm [shape: f32[1,32,32], index: 12, kind: output, shape index: {1}]  }
   0x1   :  { %v1130_v0 = vld [vmem:[%s1386_s3 + $0x10] sm:$0xff]  ;;  %v1135_v1 = vld [vmem:[%s1386_s3] sm:$0xff]  ;;  %1033 = vset.pattern.permute.xlu1 %v1056_v2  ;;  %1032 = vset.pattern.permute.xlu0 %v1056_v2  ;;  %v1142_v3 = vld [vmem:[%s1386_s3 + $0x18] sm:$0xff] }
   0x2   :  { %136 = vperm.xlu1 %1033, %v1130_v0   ;;  %126 = vperm.xlu0 %1032, %v1135_v1   ;;  %v1147_v4 = vld [vmem:[%s1386_s3 + $0x8] sm:$0xff] }
   0x3   :  { %18 = vsyncpa [#allocation3], 0  ;;  %v169_v5 = vld [vmem:[%s1387_s4 + $0x8] sm:$0xff]  ;;  %v1157_v6 = vld [vmem:[%s1385_s2 + $0x18] sm:$0xff]  ;;  %s1057_s22 = smov 8   ;;  %vm107_vm0 = vcmask 1046528  }
   0x4   :  { %v1162_v7 = vld [vmem:[%s1385_s2 + $0x10] sm:$0xff]  ;;  %1022 = vmatprep.subr.mxu1 %v169_v5  ;;  %972 = vmatprep.subr.mxu0 %v169_v5  ;;  %v168_v8 = vld [vmem:[%s1387_s4] sm:$0xff]  ;;  %v1172_v9 = vld [vmem:[%s1383_s0 + $0x18] sm:$0xff]  ;;  %vm49_vm1 = vcmask 1040384   ;;  %vm102_vm2 = vcmask 64512   ;;  %vm170_vm3 = vcmask 130048  }
   0x5   :  { %1024 = vmatpush3.msra.mxu1 %v169_v5  ;;  %973 = vmatpush3.msra.mxu0 %v169_v5  ;;  %v1177_v10 = vld [vmem:[%s1383_s0 + $0x10] sm:$0xff]  ;;  %v269_v11 = vld [vmem:[%s1388_s5 + $0x8] sm:$0xff]  ;;  %v1189_v12 = vld [vmem:[%s1383_s0] sm:$0xff]  ;;  %v113_v17 = vrot.slane %v1172_v9, 1  ;;  %v55_v28 = vrot.slane %v1172_v9, 7  ;;  %vm879_vm4 = vcmask 195584  }
   0x6   :  { %141 = vperm.xlu1 %1033, %v1142_v3   ;;  %131 = vperm.xlu0 %1032, %v1147_v4   ;;  %v1194_v13 = vld [vmem:[%s1383_s0 + $0x8] sm:$0xff]  ;;  %v108_v14 = vrot.slane %v1189_v12, 1  ;;  %v111_v16 = vrot.slane %v1177_v10, 1  ;;  %v53_v27 = vrot.slane %v1177_v10, 7  ;;  %v1215_v36 = vld [vmem:[%s1385_s2] sm:$0xff]  ;;  %v50_v54 = vrot.slane %v1189_v12, 7 }
   0x7   :  { %1023 = vmatprep.subr.mxu1 %v168_v8  ;;  %974 = vmatprep.subr.mxu0 %v168_v8  ;;  %v109_v15 = vrot.slane %v1194_v13, 1  ;;  %v51_v29 = vrot.slane %v1194_v13, 7  ;;  %v119_v31 = vsel %vm107_vm0, %v113_v17, 0.0  ;;  %v63_v42 = vld [vmem:[%s1385_s2 + $0x8] sm:$0xff]  ;;  %v268_v45 = vld [vmem:[%s1388_s5] sm:$0xff]  ;;  %s1058_s2 = smov 120  }
   0x8   :  { %1025 = vmatpush3.msra.mxu1 %v168_v8  ;;  %975 = vmatpush3.msra.mxu0 %v168_v8  ;;  %v114_v20 = vsel %vm107_vm0, %v111_v16, %v113_v17  ;;  %v56_v33 = vsel %vm49_vm1, %v53_v27, %v55_v28  ;;  %v61_v56 = vsel %vm49_vm1, 0.0, %v50_v54  ;;  %v650_v5 = vld [vmem:[%s1391_s8 + $0x8] sm:$0xff]  ;;  %v649_v8 = vld [vmem:[%s1391_s8] sm:$0xff]  ;;  %vm895_vm5 = vcmask 261120  }
   0x9   :  { %982 = vmatprep.subr.mxu1 %v269_v11  ;;  %v110_v18 = vsel %vm107_vm0, %v108_v14, %v109_v15  ;;  %v112_v23 = vsel %vm107_vm0, %v109_v15, %v111_v16  ;;  %v54_v35 = vsel %vm49_vm1, %v51_v29, %v53_v27  ;;  %v52_v59 = vsel %vm49_vm1, %v50_v54, %v51_v29  ;;  %v928_v16 = vld [vmem:[%s1392_s9] ss:$0 sm:$0xff]  ;;  %v400_v29 = vld [vmem:[%s1384_s1 + $0x10] sm:$0xff] }
   0xa   :  { %83 = vperm.xlu1 %1033, %v1157_v6   ;;  %78 = vperm.xlu0 %1032, %v1162_v7  }
   0xe   :  { %96 = vrot.lane.b32.xlu1 %v1172_v9, %s1057_s22  ;;  %94 = vrot.lane.b32.xlu0 %v1177_v10, %s1057_s22 }
  0x7d   :  { %v137_v19 = vpop.permute.xlu1 %136  ;;  %v127_v21 = vpop.permute.xlu0 %126 }
  0x7e   :  { %v144_v22 = vmul.f32 %v127_v21, %v110_v18  ;;  %v146_v24 = vmul.f32 %v137_v19, %v114_v20 }
  0x80   :  { %152 = vrot.lane.b32.xlu0 %v144_v22, %s1057_s22  ;;  %v551_v22 = vld [vmem:[%s1389_s6 + $0x8] sm:$0xff] }
  0x81   :  { %v142_v25 = vpop.permute.xlu1 %141  ;;  %v132_v26 = vpop.permute.xlu0 %131  ;;  %992 = vmatprep.subr.mxu0 %v551_v22 }
  0x82   :  { %v145_v30 = vmul.f32 %v132_v26, %v112_v23  ;;  %v147_v37 = vmul.f32 %v142_v25, %v119_v31  ;;  %v550_v23 = vld [vmem:[%s1389_s6] sm:$0xff] }
  0x84   :  { %154 = vrot.lane.b32.xlu1 %v145_v30, %s1057_s22  ;;  %156 = vrot.lane.b32.xlu0 %v146_v24, %s1057_s22  ;;  %v401_v24 = vld [vmem:[%s1384_s1 + $0x18] sm:$0xff] }
  0x85   :  { %v84_v32 = vpop.permute.xlu1 %83  ;;  %v79_v34 = vpop.permute.xlu0 %78 }
  0x86   :  { %v89_v38 = vmul.f32 %v84_v32, %v56_v33  ;;  %v88_v39 = vmul.f32 %v79_v34, %v54_v35 }
  0x88   :  { %158 = vrot.lane.b32.xlu1 %v147_v37, %s1057_s22  ;;  %68 = vperm.xlu0 %1032, %v1215_v36   ;;  %v745_v37 = vld [vmem:[%s1390_s7 + $0x8] sm:$0xff] }
  0x89   :  { %v97_v40 = vpop.permute.xlu1 %96  ;;  %v95_v41 = vpop.permute.xlu0 %94 }
  0x8a   :  { %v106_v43 = vsel %vm102_vm2, %v89_v38, %v97_v40  ;;  %v105_v44 = vsel %vm102_vm2, %v88_v39, %v95_v41 }
  0x8b   :  { %979 = vmatprep.mubr.msk.f32.mxu1 %vm170_vm3, %v105_v44 }
  0x8c   :  { %73 = vperm.xlu1 %1033, %v63_v42   ;;  %980 = vmatmul.mubr.msk.f32.vlgmr.msra.gmra.mxu1 %vm170_vm3, %v106_v43 }
  0x8d   :  { %90 = vrot.lane.b32.xlu0 %v1189_v12, %s1057_s22  ;;  %983 = vmatpush3.msra.mxu1 %v269_v11 }
  0x8e   :  { %984 = vmatprep.subr.mxu1 %v268_v45 }
  0x8f   :  { %985 = vmatpush3.msra.mxu1 %v268_v45 }
  0x90   :  { %92 = vrot.lane.b32.xlu1 %v1194_v13, %s1057_s22  ;;  %1002 = vmatprep.subr.mxu1 %v650_v5 }
  0xf2   :  { %v153_v46 = vpop.permute.xlu0 %152 }
  0xf3   :  { %v164_v47 = vsel %vm102_vm2, %v1189_v12, %v153_v46 }
  0xf4   :  { %986 = vmatprep.mubr.msk.f32.mxu1 %vm170_vm3, %v164_v47 }
  0xf6   :  { %v155_v48 = vpop.permute.xlu1 %154  ;;  %v157_v49 = vpop.permute.xlu0 %156 }
  0xf7   :  { %v165_v50 = vsel %vm102_vm2, %v1194_v13, %v155_v48  ;;  %v166_v51 = vsel %vm102_vm2, %v1177_v10, %v157_v49 }
  0xf8   :  { %987 = vmatmul.mubr.msk.f32.vlgmr.msra.gmra.mxu1 %vm170_vm3, %v165_v50 }
  0xf9   :  { %989 = vmatprep.mubr.msk.f32.mxu1 %vm170_vm3, %v166_v51  ;;  %1003 = vmatpush3.msra.mxu1 %v650_v5 }
  0xfa   :  { %v159_v52 = vpop.permute.xlu1 %158  ;;  %1004 = vmatprep.subr.mxu1 %v649_v8 }
  0xfb   :  { %v167_v53 = vsel %vm102_vm2, %v1172_v9, %v159_v52  ;;  %1005 = vmatpush3.msra.mxu1 %v649_v8 }
  0xfc   :  { %990 = vmatmul.mubr.msk.f32.gmra.mxu1 %vm170_vm3, %v167_v53 }
 0x103   :  { %v69_v55 = vpop.permute.xlu0 %68 }
 0x104   :  { %v86_v57 = vmul.f32 %v69_v55, %v61_v56 }
 0x107   :  { %v74_v58 = vpop.permute.xlu1 %73  ;;  %v91_v60 = vpop.permute.xlu0 %90 }
 0x108   :  { %v103_v61 = vsel %vm102_vm2, %v86_v57, %v91_v60  ;;  %v87_v62 = vmul.f32 %v74_v58, %v52_v59 }
 0x109   :  { %976 = vmatprep.mubr.msk.f32.mxu0 %vm170_vm3, %v103_v61 }
 0x10b   :  { %v93_v63 = vpop.permute.xlu1 %92 }
 0x10c   :  { %v104_v2 = vsel %vm102_vm2, %v87_v62, %v93_v63 }
 0x10d   :  { %977 = vmatmul.mubr.msk.f32.vlgmr.msra.gmra.mxu0 %vm170_vm3, %v104_v2 }
 0x10e   :  { %993 = vmatpush3.msra.mxu0 %v551_v22 }
 0x10f   :  { %994 = vmatprep.subr.mxu0 %v550_v23 }
 0x110   :  { %995 = vmatpush3.msra.mxu0 %v550_v23 }
 0x111   :  { %1012 = vmatprep.subr.mxu0 %v745_v37 }
 0x14c   :  { %v981_v9 = vpop.f32.mrf.mxu1 }
 0x14e   :  { %v259_v10 = vpop.f32.mrf.mxu1 }
 0x1b8   :  { %v988_v11 = vpop.f32.mrf.mxu1 }
 0x1b9   :  { %373 = vrot.lane.b32.xlu1 %v988_v11, %s1057_s22 }
 0x1ba   :  { %v348_v12 = vpop.f32.mrf.mxu1 }
 0x1bb   :  { %371 = vrot.lane.b32.xlu0 %v348_v12, %s1057_s22 }
 0x1bc   :  { %v991_v13 = vpop.f32.mrf.mxu1 }
 0x1bd   :  { %377 = vrot.lane.b32.xlu1 %v991_v13, %s1057_s22 }
 0x1be   :  { %v358_v14 = vpop.f32.mrf.mxu1 }
 0x1bf   :  { %375 = vrot.lane.b32.xlu0 %v358_v14, %s1057_s22 }
 0x1c1   :  { %501 = vperm.xlu1 %1033, %v1147_v4  }
 0x1c3   :  { %496 = vperm.xlu0 %1032, %v1135_v1   ;;  %v399_v1 = vld [vmem:[%s1384_s1 + $0x8] sm:$0xff] }
 0x1c5   :  { %511 = vperm.xlu1 %1033, %v1142_v3  }
 0x1c7   :  { %506 = vperm.xlu0 %1032, %v1130_v0  }
 0x1c9   :  { %445 = vperm.xlu1 %1033, %v63_v42  }
 0x1cb   :  { %440 = vperm.xlu0 %1032, %v1215_v36  }
 0x1cd   :  { %450 = vperm.xlu1 %1033, %v1162_v7   ;;  %v978_v15 = vpop.f32.mrf.mxu0  ;;  %v398_v7 = vld [vmem:[%s1384_s1] sm:$0xff] }
 0x1cf   :  { %455 = vperm.xlu0 %1032, %v1157_v6   ;;  %v249_v0 = vpop.f32.mrf.mxu0 }
 0x22b   :  { %v374_v17 = vpop.permute.xlu1 %373 }
 0x22c   :  { %v384_v3 = vsel %vm102_vm2, %v978_v15, %v374_v17 }
 0x22d   :  { %v395_v4 = vadd.f32 %v928_v16, %v384_v3  ;;  %v372_v18 = vpop.permute.xlu0 %371 }
 0x22e   :  { %v383_v6 = vsel %vm102_vm2, %v249_v0, %v372_v18 }
 0x22f   :  { %v403_v19 = vadd.f32 %v399_v1, %v395_v4  ;;  %v394_v20 = vadd.f32 %v928_v16, %v383_v6  ;;  %v378_v21 = vpop.permute.xlu1 %377 }
 0x230   :  { %v386_v25 = vsel %vm102_vm2, %v981_v9, %v378_v21 }
 0x231   :  { %407 = vst.msk [vmem:[%s1394_s11 + $0x8] sm:$0xff] %vm170_vm3, %v403_v19  ;;  %v402_v26 = vadd.f32 %v398_v7, %v394_v20  ;;  %v397_v27 = vadd.f32 %v928_v16, %v386_v25  ;;  %v376_v28 = vpop.permute.xlu0 %375  ;;  %464 = vrot.lane.b32.xlu1 %v403_v19, %s1057_s22  ;;  %v415_v35 = vrot.slane %v403_v19, 7  ;;  %v479_v39 = vrot.slane %v403_v19, 1 }
 0x232   :  { %v385_v30 = vsel %vm102_vm2, %v259_v10, %v376_v28 }
 0x233   :  { %406 = vst.msk [vmem:[%s1394_s11] sm:$0xff] %vm170_vm3, %v402_v26  ;;  %v405_v31 = vadd.f32 %v401_v24, %v397_v27  ;;  %v396_v32 = vadd.f32 %v928_v16, %v385_v30  ;;  %462 = vrot.lane.b32.xlu0 %v402_v26, %s1057_s22  ;;  %1006 = vmatprep.mubr.msk.f32.mxu1 %vm170_vm3, %v402_v26  ;;  %v414_v33 = vrot.slane %v402_v26, 7  ;;  %v478_v38 = vrot.slane %v402_v26, 1  ;;  %v744_v16 = vld [vmem:[%s1390_s7] sm:$0xff]  ;;  %s1059_s7 = smov 24  }
 0x234   :  { %1007 = vmatmul.mubr.msk.f32.vlgmr.msra.gmra.mxu1 %vm170_vm3, %v403_v19 }
 0x235   :  { %409 = vst.msk [vmem:[%s1394_s11 + $0x18] sm:$0xff] %vm170_vm3, %v405_v31  ;;  %v404_v34 = vadd.f32 %v400_v29, %v396_v32  ;;  %468 = vrot.lane.b32.xlu1 %v405_v31, %s1057_s22  ;;  %v416_v36 = vsel %vm49_vm1, %v414_v33, %v415_v35  ;;  %v480_v41 = vsel %vm107_vm0, %v478_v38, %v479_v39  ;;  %v419_v46 = vrot.slane %v405_v31, 7 }
 0x236   :  { %v483_v51 = vrot.slane %v405_v31, 1 }
 0x237   :  { %408 = vst.msk [vmem:[%s1394_s11 + $0x10] sm:$0xff] %vm170_vm3, %v404_v34  ;;  %518 = vrot.lane.b32.xlu0 %v402_v26, %s1058_s2  ;;  %1009 = vmatprep.mubr.msk.f32.mxu1 %vm170_vm3, %v404_v34  ;;  %v417_v42 = vrot.slane %v404_v34, 7  ;;  %v481_v44 = vrot.slane %v404_v34, 1 }
 0x238   :  { %1010 = vmatmul.mubr.msk.f32.gmra.mxu1 %vm170_vm3, %v405_v31  ;;  %v489_v56 = vsel %vm107_vm0, %v483_v51, 0.0 }
 0x239   :  { %423 = vrot.lane.b32.xlu1 %v416_v36, %s1058_s2  ;;  %v418_v45 = vsel %vm49_vm1, %v415_v35, %v417_v42  ;;  %v420_v48 = vsel %vm49_vm1, %v417_v42, %v419_v46  ;;  %v482_v49 = vsel %vm107_vm0, %v479_v39, %v481_v44  ;;  %v484_v53 = vsel %vm107_vm0, %v481_v44, %v483_v51  ;;  %v941_v44 = vld [vmem:[%s1393_s10] ss:$0 sm:$0xff]  ;;  %s1060_s10 = smov [#allocation2]  }
 0x23a   :  { %s907_s17 = sshll.u32 %s1060_s10, 4  ;;  %s908_s17 = int_to_ptr.vmem [resolvable:$true] %s907_s17 }
 0x23b   :  { %421 = vrot.lane.b32.xlu0 %v414_v33, %s1058_s2  ;;  %s1034_s18 = scalar_lea.vmem %s908_s17, 512  ;;  %p1039_p1 = scmp.lt.s32.totalorder %s908_s17, %s908_s17 }
 0x23c   :  { %v502_v47 = vpop.permute.xlu1 %501  ;;  %p1035_p0 = scmp.ne.s32.totalorder %s908_s17, %s1034_s18  ;;  %p1040_p2 = scmp.lt.s32.totalorder %s1034_s18, %s1034_s18 }
 0x23d   :  { %v515_v50 = vmul.f32 %v502_v47, %v482_v49 }
 0x23e   :  { %v497_v40 = vpop.permute.xlu0 %496  ;;  %p1041_p3 = por %p1040_p2, %p1039_p1 }
 0x23f   :  { %v514_v43 = vmul.f32 %v497_v40, %v480_v41  ;;  %466 = vrot.lane.b32.xlu0 %v404_v34, %s1057_s22 }
 0x240   :  { %v512_v55 = vpop.permute.xlu1 %511  ;;  %p1042_p4 = pnand %p1041_p3, %p1035_p0 }
 0x241   :  { %534 = vrot.lane.b32.xlu1 %v514_v43, %s1057_s22  ;;  %v517_v57 = vmul.f32 %v512_v55, %v489_v56 }
 0x242   :  { %v507_v52 = vpop.permute.xlu0 %506 }
 0x243   :  { %425 = vrot.lane.b32.xlu0 %v418_v45, %s1058_s2  ;;  %v516_v54 = vmul.f32 %v507_v52, %v484_v53 }
 0x244   :  { %v446_v58 = vpop.permute.xlu1 %445 }
 0x245   :  { %427 = vrot.lane.b32.xlu1 %v420_v48, %s1058_s2 }
 0x246   :  { %v441_v59 = vpop.permute.xlu0 %440 }
 0x247   :  { %520 = vrot.lane.b32.xlu0 %v403_v19, %s1058_s2 }
 0x248   :  { %v451_v60 = vpop.permute.xlu1 %450 }
 0x249   :  { %536 = vrot.lane.b32.xlu1 %v515_v50, %s1057_s22 }
 0x24a   :  { %v456_v61 = vpop.permute.xlu0 %455 }
 0x24b   :  { %522 = vrot.lane.b32.xlu0 %v404_v34, %s1058_s2 }
 0x24d   :  { %538 = vrot.lane.b32.xlu1 %v516_v54, %s1057_s22 }
 0x24f   :  { %524 = vrot.lane.b32.xlu0 %v405_v31, %s1058_s2 }
 0x251   :  { %540 = vrot.lane.b32.xlu1 %v517_v57, %s1057_s22 }
 0x2a3   :  { %v465_v62 = vpop.permute.xlu1 %464 }
 0x2a5   :  { %v463_v63 = vpop.permute.xlu0 %462 }
 0x2a7   :  { %v469_v2 = vpop.permute.xlu1 %468 }
 0x2a9   :  { %v519_v5 = vpop.permute.xlu0 %518 }
 0x2ab   :  { %v424_v8 = vpop.permute.xlu1 %423 }
 0x2ac   :  { %v459_v10 = vmul.f32 %v446_v58, %v424_v8 }
 0x2ad   :  { %v422_v9 = vpop.permute.xlu0 %421 }
 0x2ae   :  { %v433_v11 = vsel %vm49_vm1, 0.0, %v422_v9  ;;  %v475_v15 = vsel %vm102_vm2, %v459_v10, %v465_v62 }
 0x2af   :  { %v458_v12 = vmul.f32 %v441_v59, %v433_v11 }
 0x2b1   :  { %v467_v13 = vpop.permute.xlu0 %466  ;;  %v474_v14 = vsel %vm102_vm2, %v458_v12, %v463_v63 }
 0x2b2   :  { %996 = vmatprep.mubr.msk.f32.mxu0 %vm170_vm3, %v474_v14 }
 0x2b3   :  { %997 = vmatmul.mubr.msk.f32.vlgmr.msra.gmra.mxu0 %vm170_vm3, %v475_v15  ;;  %v535_v17 = vpop.permute.xlu1 %534 }
 0x2b4   :  { %1013 = vmatpush3.msra.mxu0 %v745_v37  ;;  %v546_v19 = vsel %vm102_vm2, %v519_v5, %v535_v17 }
 0x2b5   :  { %v426_v1 = vpop.permute.xlu0 %425  ;;  %1014 = vmatprep.subr.mxu0 %v744_v16 }
 0x2b6   :  { %v460_v3 = vmul.f32 %v451_v60, %v426_v1  ;;  %1015 = vmatpush3.msra.mxu0 %v744_v16 }
 0x2b7   :  { %v428_v0 = vpop.permute.xlu1 %427 }
 0x2b8   :  { %v461_v4 = vmul.f32 %v456_v61, %v428_v0  ;;  %v476_v18 = vsel %vm102_vm2, %v460_v3, %v467_v13 }
 0x2b9   :  { %v521_v7 = vpop.permute.xlu0 %520  ;;  %999 = vmatprep.mubr.msk.f32.mxu0 %vm170_vm3, %v476_v18 }
 0x2ba   :  { %v477_v6 = vsel %vm102_vm2, %v461_v4, %v469_v2 }
 0x2bb   :  { %1000 = vmatmul.mubr.msk.f32.gmra.mxu0 %vm170_vm3, %v477_v6  ;;  %v537_v20 = vpop.permute.xlu1 %536 }
 0x2bc   :  { %1016 = vmatprep.mubr.msk.f32.mxu0 %vm170_vm3, %v546_v19  ;;  %v547_v22 = vsel %vm102_vm2, %v521_v7, %v537_v20 }
 0x2bd   :  { %v523_v21 = vpop.permute.xlu0 %522 }
 0x2bf   :  { %1017 = vmatmul.mubr.msk.f32.vlgmr.msra.gmra.mxu0 %vm170_vm3, %v547_v22  ;;  %v539_v23 = vpop.permute.xlu1 %538 }
 0x2c0   :  { %v548_v24 = vsel %vm102_vm2, %v523_v21, %v539_v23 }
 0x2c1   :  { %1019 = vmatprep.mubr.msk.f32.mxu0 %vm170_vm3, %v548_v24  ;;  %v525_v25 = vpop.permute.xlu0 %524 }
 0x2c3   :  { %v541_v26 = vpop.permute.xlu1 %540 }
 0x2c4   :  { %v549_v27 = vsel %vm102_vm2, %v525_v25, %v541_v26 }
 0x2c5   :  { %1020 = vmatmul.mubr.msk.f32.gmra.mxu0 %vm170_vm3, %v549_v27 }
 0x2f4   :  { %v1008_v28 = vpop.f32.mrf.mxu1 }
 0x2f5   :  { %849 = vrot.lane.b32.xlu1 %v1008_v28, %s1057_s22 }
 0x2f6   :  { %v725_v29 = vpop.f32.mrf.mxu1 }
 0x2f7   :  { %847 = vrot.lane.b32.xlu0 %v725_v29, %s1057_s22 }
 0x2f8   :  { %v1011_v30 = vpop.f32.mrf.mxu1 }
 0x2f9   :  { %853 = vrot.lane.b32.xlu1 %v1011_v30, %s1057_s22 }
 0x2fa   :  { %v735_v31 = vpop.f32.mrf.mxu1 }
 0x2fb   :  { %851 = vrot.lane.b32.xlu0 %v735_v31, %s1057_s22 }
 0x367   :  { %v850_v40 = vpop.permute.xlu1 %849 }
 0x369   :  { %v848_v41 = vpop.permute.xlu0 %847 }
 0x36b   :  { %v854_v42 = vpop.permute.xlu1 %853 }
 0x36d   :  { %v852_v43 = vpop.permute.xlu0 %851 }
 0x373   :  { %v998_v32 = vpop.f32.mrf.mxu0 }
 0x374   :  { %v876_v45 = vsel %vm102_vm2, %v998_v32, %v850_v40 }
 0x375   :  { %v630_v33 = vpop.f32.mrf.mxu0 }
 0x376   :  { %v875_v48 = vsel %vm102_vm2, %v630_v33, %v848_v41 }
 0x37b   :  { %v1001_v34 = vpop.f32.mrf.mxu0 }
 0x37c   :  { %v878_v53 = vsel %vm102_vm2, %v1001_v34, %v854_v42 }
 0x37d   :  { %v640_v35 = vpop.f32.mrf.mxu0 }
 0x37e   :  { %v877_v56 = vsel %vm102_vm2, %v640_v35, %v852_v43 }
 0x37f   :  { %v1018_v36 = vpop.f32.mrf.mxu0 }
 0x380   :  { %865 = vrot.lane.b32.xlu1 %v1018_v36, %s1059_s7 }
 0x381   :  { %v824_v37 = vpop.f32.mrf.mxu0 }
 0x382   :  { %863 = vrot.lane.b32.xlu0 %v824_v37, %s1059_s7 }
 0x385   :  { %v1021_v38 = vpop.f32.mrf.mxu0 }
 0x386   :  { %869 = vrot.lane.b32.xlu1 %v1021_v38, %s1059_s7 }
 0x387   :  { %v834_v39 = vpop.f32.mrf.mxu0 }
 0x388   :  { %867 = vrot.lane.b32.xlu0 %v834_v39, %s1059_s7 }
 0x3f2   :  { %v866_v46 = vpop.permute.xlu1 %865 }
 0x3f3   :  { %v881_v47 = vsel %vm879_vm4, %v876_v45, %v866_v46 }
 0x3f4   :  { %v892_v49 = vadd.f32 %v941_v44, %v881_v47  ;;  %v864_v50 = vpop.permute.xlu0 %863 }
 0x3f5   :  { %v880_v51 = vsel %vm879_vm4, %v875_v48, %v864_v50 }
 0x3f6   :  { %897 = vst.msk [vmem:[#allocation2 + $0x8] sm:$0xff] %vm895_vm5, %v892_v49  ;;  %v891_v52 = vadd.f32 %v941_v44, %v880_v51 }
 0x3f8   :  { %896 = vst.msk [vmem:[#allocation2] sm:$0xff] %vm895_vm5, %v891_v52  ;;  %v870_v54 = vpop.permute.xlu1 %869 }
 0x3f9   :  { %v883_v55 = vsel %vm879_vm4, %v878_v53, %v870_v54 }
 0x3fa   :  { %v894_v57 = vadd.f32 %v941_v44, %v883_v55  ;;  %v868_v58 = vpop.permute.xlu0 %867 }
 0x3fb   :  { %v882_v59 = vsel %vm879_vm4, %v877_v56, %v868_v58 }
 0x3fc   :  { %899 = vst.msk [vmem:[#allocation2 + $0x18] sm:$0xff] %vm895_vm5, %v894_v57  ;;  %v893_v60 = vadd.f32 %v941_v44, %v882_v59 }
 0x3fe   :  { %898 = vst.msk [vmem:[#allocation2 + $0x10] sm:$0xff] %vm895_vm5, %v893_v60 }
 0x3ff   :  { %1045 = shalt.err (!%p1042_p4)
}
 0x400   :  { %s1061_s19 = smov 128  }
 0x401   :  { %913 = dma.vmem_to_hbm [thread:$0]  %s908_s17, 512, %s1395_s12, [#allocation3], %s1061_s19, %s1061_s19, %s1057_s22  }
 0x402   :  { %1054 = dma.done.wait [#allocation3], 512  }
 0x403   :  { %1055 = vsyncadd [#allocation3], 4294966784 }
 0x404   :  { %919 = vsyncpa [#allocation3], 1 }

</bundles_post_ra>
